<compile_context>
chip_gen: v6e
topology: v6e:2x2x1
jax: 0.10.0
libtpu: 0.0.40
codegen_flags: <defaults>
</compile_context>

<pallas_src>
import jax
import jax.numpy as jnp
from jax.experimental import pallas as pl
from jax.experimental.pallas import tpu as pltpu

_LANE = 128                            # minimum lane-dense last dim
_MAX_LANES = 8192                      # cap on lane-dense row width
_SUBLANE_MULTIPLE = 32                 # covers f32/bf16/int8/fp8 sublane tiles
_TARGET_BLOCK_BYTES = 4 * 1024 * 1024  # ~4 MiB per block (dtype-aware rows)
_VMEM_LIMIT_BYTES = 32 * 1024 * 1024   # 2 operands x 2 buffers x 4 MiB = 16 MiB


def _copy_kernel(x_ref, o_ref):
    # Simple tile copy: (block_rows, lanes) in -> (block_rows, lanes) out.
    o_ref[...] = x_ref[...]


def _run_slab_copy(slab: jax.Array) -> jax.Array:
    """Tiled, lane-dense Pallas copy of a 2-D slab (rows, lanes)."""
    rows, lanes = slab.shape
    itemsize = jnp.dtype(slab.dtype).itemsize

    # Byte-budgeted block rows, multiple of 32 (legal sublane tile for all
    # supported dtypes). A block equal to the full row extent is always legal.
    budget_rows = (_TARGET_BLOCK_BYTES // (lanes * itemsize))
    budget_rows = max(_SUBLANE_MULTIPLE,
                      (budget_rows // _SUBLANE_MULTIPLE) * _SUBLANE_MULTIPLE)
    block_rows = rows if rows <= budget_rows else budget_rows

    grid = (pl.cdiv(rows, block_rows),)

    return pl.pallas_call(
        _copy_kernel,
        out_shape=jax.ShapeDtypeStruct((rows, lanes), slab.dtype),
        grid=grid,
        in_specs=[pl.BlockSpec((block_rows, lanes), lambda i: (i, 0))],
        out_specs=pl.BlockSpec((block_rows, lanes), lambda i: (i, 0)),
        # SelectItem is identity: alias output to input (zero extra HBM
        # allocation when the buffer is donatable under jit).
        input_output_aliases={0: 0},
        compiler_params=pltpu.CompilerParams(
            # "parallel" grid axes are sharded across v7x's two TensorCores.
            dimension_semantics=("parallel",),
            vmem_limit_bytes=_VMEM_LIMIT_BYTES,
        ),
    )(slab)


def _choose_lanes(shape) -> int | None:
    """Largest convenient trailing-dims product that is a multiple of 128."""
    p = 1
    for d in reversed(shape):
        p *= d
        if p > _MAX_LANES:
            break
        if p % _LANE == 0:
            return p
    return None


def _pallas_copy(x: jax.Array) -> jax.Array:
    """Materialize `x` through a tiled, lane-dense Pallas copy kernel."""
    n = x.size
    if n == 0:
        return x  # degenerate: nothing to copy, avoid a zero-size grid

    orig_shape = x.shape

    # Preferred path: trailing dims already form a multiple-of-128 lane dim
    # (free reshape, wide unmasked rows, fewer grid steps).
    lanes = _choose_lanes(orig_shape)
    if lanes is not None:
        slab = x.reshape((n // lanes, lanes))
        return _run_slab_copy(slab).reshape(orig_shape)

    flat = x.reshape((n,))

    # Flat size is 128-aligned: standard (rows, 128) slab.
    if n % _LANE == 0:
        slab = flat.reshape((n // _LANE, _LANE))
        return _run_slab_copy(slab).reshape(orig_shape)

    n_aligned = (n // _LANE) * _LANE
    if n_aligned == 0:
        # Tiny array (< 128 elements): one block equal to the full array dims.
        slab = flat.reshape((1, n))
        return _run_slab_copy(slab).reshape(orig_shape)

    # Unaligned size: kernel on the 128-aligned prefix, trivial jnp copy for
    # the <128-element tail (no whole-tensor pad / slice round trips).
    head = flat[:n_aligned].reshape((n_aligned // _LANE, _LANE))
    out_head = _run_slab_copy(head).reshape((n_aligned,))
    tail = flat[n_aligned:]
    return jnp.concatenate([out_head, tail]).reshape(orig_shape)


class SelectItemPallas:
    """Mirror of the PyTorch SelectItem module.

    Selection happens at trace time (free); only the selected item's data is
    touched by the Pallas copy kernel. Supports nested selections (e.g.
    picking (h, c) from an LSTM's (output, (h, c)) return) via tree_map over
    the selected pytree.
    """

    def __init__(self, item_index: int):
        self._name = "selectitem"
        self.item_index = item_index

    def __call__(self, inputs):
        selected = inputs[self.item_index]
        return jax.tree_util.tree_map(_pallas_copy, selected)


if __name__ == "__main__":
    key = jax.random.PRNGKey(0)
    batch, seq, hidden = 2, 8, 32
    n_items = 3
    item_index = 0  # e.g. SelectItem(0) picking the LSTM `output` tensor

    keys = jax.random.split(key, n_items)
    inputs = tuple(
        jax.random.normal(k, (batch, seq, hidden), dtype=jnp.float32)
        for k in keys
    )

    mod = SelectItemPallas(item_index)
    out = jax.block_until_ready(mod(inputs))
    ref = inputs[item_index]
    assert out.shape == ref.shape and out.dtype == ref.dtype
    assert jnp.array_equal(out, ref)

    # Negative indexing (Python sequence semantics).
    out_last = jax.block_until_ready(SelectItemPallas(-1)(inputs))
    assert jnp.array_equal(out_last, inputs[-1])

    # Unaligned total size (exercises aligned-prefix + tail path).
    x_unaligned = jax.random.normal(keys[0], (7, 100), dtype=jnp.float32)
    y = jax.block_until_ready(SelectItemPallas(1)((inputs[0], x_unaligned)))
    assert jnp.array_equal(y, x_unaligned)

    # Tiny (< 128 element) bf16 tensor (single full-array block path).
    x_tiny = jax.random.normal(keys[1], (3, 5, 7), dtype=jnp.bfloat16)
    z = jax.block_until_ready(SelectItemPallas(0)((x_tiny, inputs[1])))
    assert jnp.array_equal(z, x_tiny)

    print("KERNEL_OK")
</pallas_src>

<mosaic_0001>
module attributes {stable_mosaic.version = 11 : i64} {
  func.func @_copy_kernel(%arg0: i32, %arg1: memref<2x256xf32, #tpu.memory_space<vmem>>, %arg2: memref<2x256xf32, #tpu.memory_space<vmem>>) attributes {dimension_semantics = [#tpu.dimension_semantics<parallel>], iteration_bounds = array<i64: 1>, scalar_prefetch = 0 : i64, scratch_operands = 0 : i64, tpu.core_type = #tpu.core_type<tc>, window_params = [{transform_indices = @transform_0, window_bounds = array<i64: 2, 256>}, {transform_indices = @transform_1, window_bounds = array<i64: 2, 256>}]} {
    %c0 = arith.constant 0 : index
    %c0_0 = arith.constant 0 : index
    %0 = vector.load %arg1[%c0, %c0_0] : memref<2x256xf32, #tpu.memory_space<vmem>>, vector<2x256xf32>
    %c0_1 = arith.constant 0 : index
    %c0_2 = arith.constant 0 : index
    %1 = vector.load %arg2[%c0_1, %c0_2] : memref<2x256xf32, #tpu.memory_space<vmem>>, vector<2x256xf32>
    tpu.vector_store %arg2[%c0_1, %c0_2], %0 {strides = array<i32>} : memref<2x256xf32, #tpu.memory_space<vmem>>, vector<2x256xf32>,
    return
  }
  func.func @transform_0(%arg0: i32) -> (i32, i32) {
    %c0_i32 = arith.constant 0 : i32
    %c0_i32_0 = arith.constant 0 : i32
    return %arg0, %c0_i32 : i32, i32
  }
  func.func @transform_1(%arg0: i32) -> (i32, i32) {
    %c0_i32 = arith.constant 0 : i32
    %c0_i32_0 = arith.constant 0 : i32
    return %arg0, %c0_i32 : i32, i32
  }
}

</mosaic_0001>

<bundles_post_ra>
// kernel: tpu_custom_call.1
= control target key start
LH: loop header
LB: loop body
LE: loop exit
PB: predicated region body
PF: predicated region fallthrough
CT: control target
= control target key end

     0   :  { %6 = vsyncpa [#allocation3], 0  ;;  %s102_s0 = inlined_call_operand.hbm [shape: f32[2,256], index: 0, kind: input, shape index: {}, may-alias: {0,1}]   ;;  %s103_s1 = inlined_call_operand.hbm [shape: f32[2,256], index: 1, kind: output, shape index: {}, may-alias: {0,1}]  }
   0x1   :  { %7 = vsyncpa [#allocation4], 0  ;;  %s84_s6 = smov [#allocation2]  }
   0x2   :  { %s14_s7 = sshll.u32 %s84_s6, 4  ;;  %s15_s7 = int_to_ptr.vmem [resolvable:$true] %s14_s7 }
   0x3   :  { %s48_s8 = scalar_lea.vmem %s15_s7, 64  ;;  %p53_p1 = scmp.lt.s32.totalorder %s15_s7, %s15_s7 }
   0x4   :  { %p49_p0 = scmp.ne.s32.totalorder %s15_s7, %s48_s8  ;;  %p54_p2 = scmp.lt.s32.totalorder %s48_s8, %s48_s8 }
   0x6   :  { %p55_p3 = por %p54_p2, %p53_p1 }
   0x8   :  { %p56_p4 = pnand %p55_p3, %p49_p0 }
   0xa   :  { %59 = shalt.err (!%p56_p4)
}
   0xb   :  { %17 = dma.hbm_to_vmem [thread:$0]  %s102_s0, 64, %s15_s7, [#allocation3]  }
   0xc   :  { %80 = dma.done.wait [#allocation3], 64  }
   0xd   :  { %81 = vsyncadd [#allocation3], 4294967232  ;;  %s85_s11 = smov [#allocation5]   ;;  %v21_v0 = vld [vmem:[#allocation2] sm:$0xf] }
   0xe   :  { %s29_s12 = sshll.u32 %s85_s11, 4  ;;  %22 = vst [vmem:[#allocation5] sm:$0xf] %v21_v0  ;;  %s30_s12 = int_to_ptr.vmem [resolvable:$true] %s29_s12 }
   0xf   :  { %s60_s13 = scalar_lea.vmem %s30_s12, 64  ;;  %p65_p6 = scmp.lt.s32.totalorder %s30_s12, %s30_s12 }
  0x10   :  { %p61_p5 = scmp.ne.s32.totalorder %s30_s12, %s60_s13  ;;  %p66_p7 = scmp.lt.s32.totalorder %s60_s13, %s60_s13 }
  0x12   :  { %p67_p8 = por %p66_p7, %p65_p6 }
  0x14   :  { %p68_p9 = pnand %p67_p8, %p61_p5 }
  0x16   :  { %71 = shalt.err (!%p68_p9)
}
  0x17   :  { %32 = dma.vmem_to_hbm [thread:$0]  %s30_s12, 64, %s103_s1, [#allocation4]  }
  0x18   :  { %82 = dma.done.wait [#allocation4], 64  }
  0x19   :  { %83 = vsyncadd [#allocation4], 4294967232 }
  0x1a   :  { %36 = vsyncpa [#allocation3], 1 }
  0x1b   :  { %37 = vsyncpa [#allocation4], 1 }

</bundles_post_ra>
